<compile_context>
chip_gen: v5e
topology: v5e:2x2
jax: 0.10.0
libtpu: 0.0.40
codegen_flags: <defaults>
</compile_context>

<pallas_src>
import functools
import math

import jax
import jax.numpy as jnp
from jax.experimental import pallas as pl
from jax.experimental.pallas import tpu as pltpu


# Safe on v7x (64 MiB physical VMEM); raise to 64-96 MiB on v5e/v6e at real CLIP widths.
_VMEM_LIMIT_BYTES = 48 * 1024 * 1024
_LN_EPS = 1e-5
_ACT_DTYPE = jnp.bfloat16          # inter-kernel activation / weight storage dtype


# ------------------------------------------------------------------ tile helpers

def _tile_sub(dim, target):
    """Sublane (second-to-last) tile: multiple of 8 dividing dim, else full dim."""
    if dim <= target:
        return dim
    t = (target // 8) * 8
    while t >= 8:
        if dim % t == 0:
            return t
        t -= 8
    return dim


def _tile_lane(dim, target):
    """Lane (last-dim) tile: multiple of 128 dividing dim, else full dim."""
    if dim <= target:
        return dim
    t = (target // 128) * 128
    while t >= 128:
        if dim % t == 0:
            return t
        t -= 128
    return dim


# ------------------------------------------------------------------ shared in-kernel math

def _layernorm_f32(x, gamma, beta, eps):
    x = x.astype(jnp.float32)
    mu = jnp.mean(x, axis=-1, keepdims=True)
    var = jnp.mean((x - mu) ** 2, axis=-1, keepdims=True)
    return (x - mu) * jax.lax.rsqrt(var + eps) * gamma.astype(jnp.float32) + beta.astype(jnp.float32)


# ------------------------------------------------------------------ attention block kernel
# One kernel per residual-attention "x = x + attn(ln_1(x))".
# grid = (batch, head): batch "parallel" (megacore / v7x 2-TC), head "arbitrary" (accumulated).

def _attn_block_kernel(x_ref, g_ref, bln_ref, wq_ref, bq_ref, wk_ref, bk_ref,
                       wv_ref, bv_ref, wo_ref, bo_ref, o_ref, xn_ref, acc_ref,
                       *, scale, causal, eps):
    h = pl.program_id(1)

    @pl.when(h == 0)
    def _():
        # ln_1(x) computed once per batch element, cached bf16 for all heads.
        xn_ref[...] = _layernorm_f32(x_ref[0], g_ref[...], bln_ref[...], eps).astype(xn_ref.dtype)
        acc_ref[...] = jnp.zeros_like(acc_ref)

    xn = xn_ref[...]                                                    # (L, d) bf16
    q = jnp.dot(xn, wq_ref[0], preferred_element_type=jnp.float32) + bq_ref[0]
    k = jnp.dot(xn, wk_ref[0], preferred_element_type=jnp.float32) + bk_ref[0]
    v = jnp.dot(xn, wv_ref[0], preferred_element_type=jnp.float32) + bv_ref[0]

    # bf16 MXU operands; fp32 scores / softmax.
    s = jax.lax.dot_general(q.astype(jnp.bfloat16), k.astype(jnp.bfloat16),
                            (((1,), (1,)), ((), ())),
                            preferred_element_type=jnp.float32) * scale
    if causal:
        L = s.shape[0]
        row = jax.lax.broadcasted_iota(jnp.int32, (L, L), 0)
        col = jax.lax.broadcasted_iota(jnp.int32, (L, L), 1)
        s = jnp.where(col > row, jnp.float32(-1e30), s)
    m = jnp.max(s, axis=-1, keepdims=True)
    e = jnp.exp(s - m)
    p = e * pl.reciprocal(jnp.sum(e, axis=-1, keepdims=True), approx=True)

    oh = jnp.dot(p.astype(jnp.bfloat16), v.astype(jnp.bfloat16),
                 preferred_element_type=jnp.float32)                    # (L, Dh)
    # out_proj folded per head: concat(heads) @ Wo^T == sum_h head_h @ Wo_h  (K=Dh per step).
    acc_ref[...] += jnp.dot(oh.astype(jnp.bfloat16), wo_ref[0],
                            preferred_element_type=jnp.float32)

    @pl.when(h == pl.num_programs(1) - 1)
    def _():
        o_ref[0] = (acc_ref[...] + bo_ref[...].astype(jnp.float32)
                    + x_ref[0].astype(jnp.float32)).astype(o_ref.dtype)


def pallas_attention_block(x, p, n_head, causal):
    """x:(N,L,d) bf16 -> x + MHA(ln_1(x)), fully fused in one kernel."""
    N, L, d = x.shape
    Dh = d // n_head
    scale = 1.0 / math.sqrt(Dh)
    kernel = functools.partial(_attn_block_kernel, scale=scale, causal=causal, eps=_LN_EPS)
    return pl.pallas_call(
        kernel,
        out_shape=jax.ShapeDtypeStruct((N, L, d), x.dtype),
        grid=(N, n_head),
        in_specs=[
            pl.BlockSpec((1, L, d), lambda n, h: (n, 0, 0)),     # x (resident across heads)
            pl.BlockSpec((1, d), lambda n, h: (0, 0)),           # ln_1 gamma
            pl.BlockSpec((1, d), lambda n, h: (0, 0)),           # ln_1 beta
            pl.BlockSpec((1, d, Dh), lambda n, h: (h, 0, 0)),    # Wq[h]
            pl.BlockSpec((1, 1, Dh), lambda n, h: (h, 0, 0)),    # bq[h]
            pl.BlockSpec((1, d, Dh), lambda n, h: (h, 0, 0)),    # Wk[h]
            pl.BlockSpec((1, 1, Dh), lambda n, h: (h, 0, 0)),    # bk[h]
            pl.BlockSpec((1, d, Dh), lambda n, h: (h, 0, 0)),    # Wv[h]
            pl.BlockSpec((1, 1, Dh), lambda n, h: (h, 0, 0)),    # bv[h]
            pl.BlockSpec((1, Dh, d), lambda n, h: (h, 0, 0)),    # Wo[h]
            pl.BlockSpec((1, d), lambda n, h: (0, 0)),           # out_proj bias
        ],
        out_specs=pl.BlockSpec((1, L, d), lambda n, h: (n, 0, 0)),
        scratch_shapes=[pltpu.VMEM((L, d), _ACT_DTYPE),          # cached ln_1(x)
                        pltpu.VMEM((L, d), jnp.float32)],        # fp32 head accumulator
        compiler_params=pltpu.CompilerParams(
            dimension_semantics=("parallel", "arbitrary"),
            vmem_limit_bytes=_VMEM_LIMIT_BYTES),
    )(x, p["ln1_g"], p["ln1_b"], p["wq"], p["bq"], p["wk"], p["bk"],
      p["wv"], p["bv"], p["wo"], p["out_b"])


# ------------------------------------------------------------------ MLP block kernel
# One kernel per "x = x + c_proj(gelu(c_fc(ln_2(x))))"; ff axis tiled ("arbitrary"), the
# (tm, 4d) intermediate never touches HBM, and ln_2(x) is cached across ff tiles.

def _mlp_block_kernel(x_ref, g_ref, bln_ref, wfc_ref, bfc_ref, wpr_ref, bpr_ref,
                      o_ref, xn_ref, acc_ref, *, eps):
    j = pl.program_id(1)

    @pl.when(j == 0)
    def _():
        xn_ref[...] = _layernorm_f32(x_ref[...], g_ref[...], bln_ref[...], eps).astype(xn_ref.dtype)
        acc_ref[...] = jnp.zeros_like(acc_ref)

    hcol = jnp.dot(xn_ref[...], wfc_ref[...], preferred_element_type=jnp.float32) \
        + bfc_ref[...].astype(jnp.float32)
    hcol = hcol * jax.nn.sigmoid(1.702 * hcol)                   # QuickGELU (fp32, EUP)
    acc_ref[...] += jnp.dot(hcol.astype(jnp.bfloat16), wpr_ref[...],
                            preferred_element_type=jnp.float32)

    @pl.when(j == pl.num_programs(1) - 1)
    def _():
        o_ref[...] = (acc_ref[...] + bpr_ref[...].astype(jnp.float32)
                      + x_ref[...].astype(jnp.float32)).astype(o_ref.dtype)


def pallas_mlp_block(x2, p, *, tm_target=256, tf_target=2048):
    """x2:(M,d) bf16 -> x2 + mlp(ln_2(x2))."""
    M, d = x2.shape
    FF = p["fc_w"].shape[1]
    tm = _tile_sub(M, tm_target)
    tf = _tile_lane(FF, tf_target)
    return pl.pallas_call(
        functools.partial(_mlp_block_kernel, eps=_LN_EPS),
        out_shape=jax.ShapeDtypeStruct((M, d), x2.dtype),
        grid=(M // tm, FF // tf),
        in_specs=[
            pl.BlockSpec((tm, d), lambda i, j: (i, 0)),          # x (LN source + residual)
            pl.BlockSpec((1, d), lambda i, j: (0, 0)),           # ln_2 gamma
            pl.BlockSpec((1, d), lambda i, j: (0, 0)),           # ln_2 beta
            pl.BlockSpec((d, tf), lambda i, j: (0, j)),          # c_fc weight column block
            pl.BlockSpec((1, tf), lambda i, j: (0, j)),          # c_fc bias
            pl.BlockSpec((tf, d), lambda i, j: (j, 0)),          # c_proj weight row block
            pl.BlockSpec((1, d), lambda i, j: (0, 0)),           # c_proj bias
        ],
        out_specs=pl.BlockSpec((tm, d), lambda i, j: (i, 0)),
        scratch_shapes=[pltpu.VMEM((tm, d), _ACT_DTYPE),         # cached ln_2(x)
                        pltpu.VMEM((tm, d), jnp.float32)],       # fp32 c_proj accumulator
        compiler_params=pltpu.CompilerParams(
            dimension_semantics=("parallel", "arbitrary"),
            vmem_limit_bytes=_VMEM_LIMIT_BYTES),
    )(x2, p["ln2_g"], p["ln2_b"], p["fc_w"], p["fc_b"], p["proj_w"], p["proj_b"])


# ------------------------------------------------------------------ plain GEMM (visual stand-in)

def _linear_kernel(x_ref, w_ref, b_ref, o_ref):
    o_ref[...] = (jnp.dot(x_ref[...].astype(jnp.bfloat16), w_ref[...],
                          preferred_element_type=jnp.float32)
                  + b_ref[...].astype(jnp.float32)).astype(o_ref.dtype)


def _linear_acc_kernel(x_ref, w_ref, b_ref, o_ref, acc_ref):
    k = pl.program_id(2)

    @pl.when(k == 0)
    def _():
        acc_ref[...] = jnp.zeros_like(acc_ref)

    acc_ref[...] += jnp.dot(x_ref[...].astype(jnp.bfloat16), w_ref[...],
                            preferred_element_type=jnp.float32)

    @pl.when(k == pl.num_programs(2) - 1)
    def _():
        o_ref[...] = (acc_ref[...] + b_ref[...].astype(jnp.float32)).astype(o_ref.dtype)


def pallas_linear(x, w, b, out_dtype=None, tm_target=512, tn_target=1024, tk_target=1024):
    M, K = x.shape
    N = w.shape[1]
    out_dtype = out_dtype or x.dtype
    tm = _tile_sub(M, tm_target)
    tn = _tile_lane(N, tn_target)
    tk = _tile_lane(K, tk_target)
    b2 = b.reshape(1, N)
    if K // tk == 1:
        # single K step: write dot result directly, no fp32 scratch / read-modify-write.
        return pl.pallas_call(
            _linear_kernel,
            out_shape=jax.ShapeDtypeStruct((M, N), out_dtype),
            grid=(M // tm, N // tn),
            in_specs=[pl.BlockSpec((tm, K), lambda i, j: (i, 0)),
                      pl.BlockSpec((K, tn), lambda i, j: (0, j)),
                      pl.BlockSpec((1, tn), lambda i, j: (0, j))],
            out_specs=pl.BlockSpec((tm, tn), lambda i, j: (i, j)),
            compiler_params=pltpu.CompilerParams(
                dimension_semantics=("parallel", "parallel"),
                vmem_limit_bytes=_VMEM_LIMIT_BYTES),
        )(x, w, b2)
    return pl.pallas_call(
        _linear_acc_kernel,
        out_shape=jax.ShapeDtypeStruct((M, N), out_dtype),
        grid=(M // tm, N // tn, K // tk),
        in_specs=[pl.BlockSpec((tm, tk), lambda i, j, k: (i, k)),
                  pl.BlockSpec((tk, tn), lambda i, j, k: (k, j)),
                  pl.BlockSpec((1, tn), lambda i, j, k: (0, j))],
        out_specs=pl.BlockSpec((tm, tn), lambda i, j, k: (i, j)),
        scratch_shapes=[pltpu.VMEM((tm, tn), jnp.float32)],
        compiler_params=pltpu.CompilerParams(
            dimension_semantics=("parallel", "parallel", "arbitrary"),
            vmem_limit_bytes=_VMEM_LIMIT_BYTES),
    )(x, w, b2)


# ------------------------------------------------------------------ fused LN -> projection (ln_final + text_projection)

def _ln_linear_kernel(x_ref, g_ref, b_ref, w_ref, bias_ref, o_ref, *, eps):
    xn = _layernorm_f32(x_ref[...], g_ref[...], b_ref[...], eps)
    y = jnp.dot(xn.astype(jnp.bfloat16), w_ref[...],
                preferred_element_type=jnp.float32) + bias_ref[...].astype(jnp.float32)
    o_ref[...] = y.astype(o_ref.dtype)


def pallas_ln_linear(x, gamma, beta, w, b=None, out_dtype=None, tm_target=512):
    M, K = x.shape
    N = w.shape[1]
    out_dtype = out_dtype or x.dtype
    if b is None:
        b = jnp.zeros((1, N), jnp.float32)
    tm = _tile_sub(M, tm_target)
    return pl.pallas_call(
        functools.partial(_ln_linear_kernel, eps=_LN_EPS),
        out_shape=jax.ShapeDtypeStruct((M, N), out_dtype),
        grid=(M // tm,),
        in_specs=[pl.BlockSpec((tm, K), lambda i: (i, 0)),
                  pl.BlockSpec((1, K), lambda i: (0, 0)),
                  pl.BlockSpec((1, K), lambda i: (0, 0)),
                  pl.BlockSpec((K, N), lambda i: (0, 0)),
                  pl.BlockSpec((1, N), lambda i: (0, 0))],
        out_specs=pl.BlockSpec((tm, N), lambda i: (i, 0)),
        compiler_params=pltpu.CompilerParams(
            dimension_semantics=("parallel",),
            vmem_limit_bytes=_VMEM_LIMIT_BYTES),
    )(x, gamma, beta, w, b)


# ------------------------------------------------------------------ frame-mean + cosine logits + BSCE bias

def _logits_kernel(scale_ref, img_ref, txt_ref, bsce_ref, o_ref, *, eps):
    img = jnp.mean(img_ref[...].astype(jnp.float32), axis=1)            # mean over frames
    txt = txt_ref[...].astype(jnp.float32)
    img = img * jax.lax.rsqrt(jnp.sum(img * img, axis=-1, keepdims=True) + eps)
    txt = txt * jax.lax.rsqrt(jnp.sum(txt * txt, axis=-1, keepdims=True) + eps)
    logits = scale_ref[0] * jax.lax.dot_general(
        img, txt, (((1,), (1,)), ((), ())), preferred_element_type=jnp.float32)
    o_ref[...] = (logits + bsce_ref[...].astype(jnp.float32)).astype(o_ref.dtype)


def pallas_logits(frame_feats, txt_feat, logit_scale_exp, bsce):
    """frame_feats:(B,T,H) bf16, txt_feat:(C,H) bf16 -> (B,C) fp32 logits."""
    B, T, H = frame_feats.shape
    C = txt_feat.shape[0]
    return pl.pallas_call(
        functools.partial(_logits_kernel, eps=1e-12),
        out_shape=jax.ShapeDtypeStruct((B, C), jnp.float32),
        grid=(1,),
        in_specs=[pl.BlockSpec(memory_space=pltpu.MemorySpace.SMEM),     # scalar logit scale
                  pl.BlockSpec((B, T, H), lambda i: (0, 0, 0)),
                  pl.BlockSpec((C, H), lambda i: (0, 0)),
                  pl.BlockSpec((1, C), lambda i: (0, 0))],
        out_specs=pl.BlockSpec((B, C), lambda i: (0, 0)),
        compiler_params=pltpu.CompilerParams(
            dimension_semantics=("arbitrary",),
            vmem_limit_bytes=_VMEM_LIMIT_BYTES),
    )(logit_scale_exp.reshape(1), frame_feats, txt_feat, bsce.reshape(1, C))


# ------------------------------------------------------------------ model glue

def residual_attention_block(x, p, n_head, causal):
    """x:(N,L,d) bf16.  Two fused pallas_calls: attention block + MLP block."""
    N, L, d = x.shape
    x = pallas_attention_block(x, p, n_head, causal)
    x = pallas_mlp_block(x.reshape(N * L, d), p).reshape(N, L, d)
    return x


def text_encoder(params, tokens):
    nc, ctx = tokens.shape
    x = jnp.take(params["token_embedding"], tokens, axis=0)             # glue gather (nc, ctx, w)
    x = (x + params["positional_embedding"][None]).astype(_ACT_DTYPE)
    for blk in params["text_blocks"]:
        x = residual_attention_block(x, blk, params["text_heads"], causal=True)
    eot = jnp.argmax(tokens, axis=-1)                                   # EOT positions
    x_eot = x[jnp.arange(nc), eot]                                      # glue gather (nc, w)
    # ln_final commutes with the row gather, so gather first and fuse LN + text_projection.
    return pallas_ln_linear(x_eot, params["ln_final_g"], params["ln_final_b"],
                            params["text_projection"])                  # (nc, hidden) bf16


def temporal_custom_clip_forward(params, image):
    """image: (b, t, c, h, w) fp32 frames.  Returns logits (b, num_classes) fp32."""
    b, t, c, h, w = image.shape
    # segments branch: flatten frames, encode each frame (linear stand-in for clip_model.visual)
    x = image.reshape(b * t, c * h * w)
    image_features = pallas_linear(x, params["visual_w"], params["visual_b"],
                                   out_dtype=_ACT_DTYPE)                 # (b*t, hidden) bf16
    hidden = image_features.shape[-1]

    # temporal == 'attention' (batch-major layout: (b, t, hidden) == (N, L, d))
    feats = (image_features.reshape(b, t, hidden)
             + params["temporal_embedding"][None]).astype(_ACT_DTYPE)
    for blk in params["temporal_blocks"]:
        feats = residual_attention_block(feats, blk, params["temporal_heads"], causal=False)

    text_features = text_encoder(params, params["tokenized_prompts"])    # (nc, hidden) bf16

    logit_scale_exp = jnp.exp(params["logit_scale"])
    # frame mean + L2 normalize + scaled cosine sim + balanced-CE bias, one fused kernel
    return pallas_logits(feats, text_features, logit_scale_exp, params["bsce_weights"])


# ------------------------------------------------------------------ params

def init_params(key, *, hidden=128, heads=4, numF=4, num_classes=5, ctx_len=8,
                vocab=64, text_width=128, text_heads=4, in_dim=3 * 16 * 16,
                temporal_layers=1, text_layers=1,
                cls_num_list=(10.0, 20.0, 30.0, 25.0, 15.0)):
    keys = iter(jax.random.split(key, 128))

    def normal(shape, std=0.02, dtype=_ACT_DTYPE):
        return (std * jax.random.normal(next(keys), shape, jnp.float32)).astype(dtype)

    def block_params(d, n_head):
        Dh = d // n_head
        return dict(
            ln1_g=jnp.ones((1, d), jnp.float32), ln1_b=jnp.zeros((1, d), jnp.float32),
            # per-head q/k/v/out-proj weights pre-split host-side (bf16) so every kernel block
            # is lane-dense (no sub-128 lane slicing in-kernel)
            wq=normal((n_head, d, Dh)), bq=jnp.zeros((n_head, 1, Dh), jnp.float32),
            wk=normal((n_head, d, Dh)), bk=jnp.zeros((n_head, 1, Dh), jnp.float32),
            wv=normal((n_head, d, Dh)), bv=jnp.zeros((n_head, 1, Dh), jnp.float32),
            wo=normal((n_head, Dh, d)), out_b=jnp.zeros((1, d), jnp.float32),
            ln2_g=jnp.ones((1, d), jnp.float32), ln2_b=jnp.zeros((1, d), jnp.float32),
            fc_w=normal((d, 4 * d)), fc_b=jnp.zeros((1, 4 * d), jnp.float32),
            proj_w=normal((4 * d, d)), proj_b=jnp.zeros((1, d), jnp.float32),
        )

    # synthetic tokenized prompts: SOT=1, random body, EOT = vocab-1 (argmax target)
    tokens = jax.random.randint(next(keys), (num_classes, ctx_len), 2, vocab - 2)
    tokens = tokens.at[:, 0].set(1).at[:, 5].set(vocab - 1).at[:, 6:].set(0)

    cls = jnp.asarray(cls_num_list, jnp.float32).reshape(1, -1)
    bsce = jnp.log(cls / jnp.sum(cls))                                   # log class priors

    return dict(
        visual_w=normal((in_dim, hidden)), visual_b=jnp.zeros((1, hidden), jnp.float32),
        temporal_embedding=normal((numF, hidden), std=0.01),             # nn.init.normal_(std=0.01)
        temporal_blocks=[block_params(hidden, heads) for _ in range(temporal_layers)],
        temporal_heads=heads,
        token_embedding=normal((vocab, text_width)),
        positional_embedding=normal((ctx_len, text_width), std=0.01),
        text_blocks=[block_params(text_width, text_heads) for _ in range(text_layers)],
        text_heads=text_heads,
        ln_final_g=jnp.ones((1, text_width), jnp.float32),
        ln_final_b=jnp.zeros((1, text_width), jnp.float32),
        text_projection=normal((text_width, hidden)),
        logit_scale=jnp.asarray(math.log(1.0 / 0.07), jnp.float32),
        tokenized_prompts=tokens,
        bsce_weights=bsce,
    )


# ------------------------------------------------------------------ main

if __name__ == "__main__":
    key = jax.random.PRNGKey(0)
    k_img, k_par = jax.random.split(key)

    b, t, c, h, w = 2, 4, 3, 16, 16        # segments=True, numF = t = 4
    num_classes = 5
    image = jax.random.normal(k_img, (b, t, c, h, w), jnp.float32)
    params = init_params(k_par, in_dim=c * h * w, numF=t, num_classes=num_classes)

    logits = temporal_custom_clip_forward(params, image)
    logits = jax.block_until_ready(logits)
    assert logits.shape == (b, num_classes), logits.shape
    assert bool(jnp.all(jnp.isfinite(logits)))
    print("KERNEL_OK")
</pallas_src>

<mosaic_0001>
module attributes {stable_mosaic.version = 11 : i64} {
  func.func @_linear_kernel(%arg0: i32, %arg1: i32, %arg2: memref<8x768xf32, #tpu.memory_space<vmem>>, %arg3: memref<768x128xbf16, #tpu.memory_space<vmem>>, %arg4: memref<1x128xf32, #tpu.memory_space<vmem>>, %arg5: memref<8x128xbf16, #tpu.memory_space<vmem>>) attributes {dimension_semantics = [#tpu.dimension_semantics<parallel>, #tpu.dimension_semantics<parallel>], iteration_bounds = array<i64: 1, 1>, scalar_prefetch = 0 : i64, scratch_operands = 0 : i64, tpu.core_type = #tpu.core_type<tc>, window_params = [{transform_indices = @transform_0, window_bounds = array<i64: 8, 768>}, {transform_indices = @transform_1, window_bounds = array<i64: 768, 128>}, {transform_indices = @transform_2, window_bounds = array<i64: 1, 128>}, {transform_indices = @transform_3, window_bounds = array<i64: 8, 128>}]} {
    %c0 = arith.constant 0 : index
    %c0_0 = arith.constant 0 : index
    %0 = vector.load %arg2[%c0, %c0_0] : memref<8x768xf32, #tpu.memory_space<vmem>>, vector<8x768xf32>
    %1 = arith.truncf %0 : vector<8x768xf32> to vector<8x768xbf16>
    %c0_1 = arith.constant 0 : index
    %c0_2 = arith.constant 0 : index
    %2 = vector.load %arg3[%c0_1, %c0_2] : memref<768x128xbf16, #tpu.memory_space<vmem>>, vector<768x128xbf16>
    %cst = arith.constant dense<0.000000e+00> : vector<8x128xf32>
    %3 = tpu.matmul %1, %2, %cst {dimension_numbers = #tpu.dot_dimension_numbers<[1], [0], [0], [1], [0, 0, 1, 1], [], []>} : vector<8x768xbf16>, vector<768x128xbf16>, vector<8x128xf32> -> vector<8x128xf32>
    %c0_3 = arith.constant 0 : index
    %c0_4 = arith.constant 0 : index
    %4 = vector.load %arg4[%c0_3, %c0_4] : memref<1x128xf32, #tpu.memory_space<vmem>>, vector<1x128xf32>
    %5 = vector.broadcast %4 : vector<1x128xf32> to vector<8x128xf32>
    %6 = arith.addf %3, %5 : vector<8x128xf32>
    %7 = arith.truncf %6 : vector<8x128xf32> to vector<8x128xbf16>
    %c0_5 = arith.constant 0 : index
    %c0_6 = arith.constant 0 : index
    %8 = vector.load %arg5[%c0_5, %c0_6] : memref<8x128xbf16, #tpu.memory_space<vmem>>, vector<8x128xbf16>
    tpu.vector_store %arg5[%c0_5, %c0_6], %7 {strides = array<i32>} : memref<8x128xbf16, #tpu.memory_space<vmem>>, vector<8x128xbf16>,
    return
  }
  func.func @transform_0(%arg0: i32, %arg1: i32) -> (i32, i32) {
    %c0_i32 = arith.constant 0 : i32
    %c0_i32_0 = arith.constant 0 : i32
    return %arg0, %c0_i32 : i32, i32
  }
  func.func @transform_1(%arg0: i32, %arg1: i32) -> (i32, i32) {
    %c0_i32 = arith.constant 0 : i32
    %c0_i32_0 = arith.constant 0 : i32
    return %c0_i32, %arg1 : i32, i32
  }
  func.func @transform_2(%arg0: i32, %arg1: i32) -> (i32, i32) {
    %c0_i32 = arith.constant 0 : i32
    %c0_i32_0 = arith.constant 0 : i32
    return %c0_i32, %arg1 : i32, i32
  }
  func.func @transform_3(%arg0: i32, %arg1: i32) -> (i32, i32) {
    %c0_i32 = arith.constant 0 : i32
    return %arg0, %arg1 : i32, i32
  }
}

</mosaic_0001>

<bundles_post_ra>
// kernel: tpu_custom_call.1
= control target key start
LH: loop header
LB: loop body
LE: loop exit
PB: predicated region body
PF: predicated region fallthrough
CT: control target
= control target key end

     0   :  { %8 = vsyncpa [#allocation3], 0  ;;  %s904_s0 = inlined_call_operand.hbm [shape: f32[8,768], index: 0, kind: input, shape index: {}]   ;;  %s905_s1 = inlined_call_operand.hbm [shape: bf16[768,128], index: 1, kind: input, shape index: {}]   ;;  %s906_s2 = inlined_call_operand.vmem [shape: f32[1,128], index: 2, kind: input, shape index: {}]   ;;  %s907_s3 = inlined_call_operand.hbm [shape: bf16[8,128], index: 3, kind: output, shape index: {}]  }
   0x1   :  { %9 = vsyncpa [#allocation6], 0 }
   0x2   :  { %10 = vsyncpa [#allocation4], 0  ;;  %s16_s14 = sshll.u32 %s904_s0, 4  ;;  %s867_s15 = smov [#allocation2]   ;;  %s17_s14 = int_to_ptr.hbm [resolvable:$true] %s16_s14 }
   0x3   :  { %s18_s16 = sshll.u32 %s867_s15, 4  ;;  %s26_s19 = sshll.u32 %s905_s1, 4  ;;  %s19_s16 = int_to_ptr.vmem [resolvable:$true] %s18_s16  ;;  %s27_s19 = int_to_ptr.hbm [resolvable:$true] %s26_s19 }
   0x4   :  { %21 = dma.hbm_to_vmem [thread:$0]  %s17_s14, 768, %s19_s16, [#allocation3]  }
   0x5   :  { %s868_s20 = smov [#allocation5]   ;;  %s869_s22 = smov 64  }
   0x6   :  { %s28_s21 = sshll.u32 %s868_s20, 4  ;;  %s870_s23 = smov 4   ;;  %s29_s21 = int_to_ptr.vmem [resolvable:$true] %s28_s21 }
   0x7   :  { %34 = dma.hbm_to_vmem [thread:$0]  %s27_s19, 6144, %s29_s21, [#allocation6], %s869_s22, %s869_s22, %s870_s23  }
   0x8   :  { %861 = dma.done.wait [#allocation3], 768  }
   0x9   :  { %862 = vsyncadd [#allocation3], 4294966528 }
   0xa   :  { %863 = dma.done.wait [#allocation6], 6144  }
   0xb   :  { %864 = vsyncadd [#allocation6], 4294961152  ;;  %v742_v0 = vld [vmem:[#allocation5 + $0x38] sm:$0xff]  ;;  %v741_v2 = vld [vmem:[#allocation5 + $0x30] sm:$0xff]  ;;  %s871_s24 = smov [#allocation7]   ;;  %s532_s28 = sshll.u32 %s907_s3, 4  ;;  %s533_s28 = int_to_ptr.hbm [resolvable:$true] %s532_s28 }
   0xc   :  { %v750_v1 = vld [vmem:[#allocation5 + $0x78] sm:$0xff]  ;;  %445 = vmatpush.bf16.msra.mxu0 %v742_v0  ;;  %v749_v3 = vld [vmem:[#allocation5 + $0x70] sm:$0xff]  ;;  %v740_v8 = vld [vmem:[#allocation5 + $0x28] sm:$0xff]  ;;  %s530_s25 = sshll.u32 %s871_s24, 4  ;;  %s531_s25 = int_to_ptr.vmem [resolvable:$true] %s530_s25 }
   0xd   :  { %458 = vmatpush.bf16.msra.mxu1 %v750_v1  ;;  %v758_v4 = vld [vmem:[#allocation5 + $0xb8] sm:$0xff]  ;;  %v757_v6 = vld [vmem:[#allocation5 + $0xb0] sm:$0xff]  ;;  %v748_v9 = vld [vmem:[#allocation5 + $0x68] sm:$0xff] }
   0xe   :  { %v766_v5 = vld [vmem:[#allocation5 + $0xf8] sm:$0xff]  ;;  %471 = vmatpush.bf16.msra.mxu2 %v758_v4  ;;  %v765_v7 = vld [vmem:[#allocation5 + $0xf0] sm:$0xff]  ;;  %v756_v10 = vld [vmem:[#allocation5 + $0xa8] sm:$0xff] }
   0xf   :  { %484 = vmatpush.bf16.msra.mxu3 %v766_v5  ;;  %v764_v11 = vld [vmem:[#allocation5 + $0xe8] sm:$0xff]  ;;  %v739_v12 = vld [vmem:[#allocation5 + $0x20] sm:$0xff]  ;;  %v738_v16 = vld [vmem:[#allocation5 + $0x18] sm:$0xff] }
  0x10   :  { %446 = vmatpush.bf16.msra.mxu0 %v741_v2  ;;  %v747_v13 = vld [vmem:[#allocation5 + $0x60] sm:$0xff]  ;;  %v746_v17 = vld [vmem:[#allocation5 + $0x58] sm:$0xff]  ;;  %v737_v20 = vld [vmem:[#allocation5 + $0x10] sm:$0xff] }
  0x11   :  { %459 = vmatpush.bf16.msra.mxu1 %v749_v3  ;;  %v755_v14 = vld [vmem:[#allocation5 + $0xa0] sm:$0xff]  ;;  %v754_v18 = vld [vmem:[#allocation5 + $0x98] sm:$0xff]  ;;  %v745_v21 = vld [vmem:[#allocation5 + $0x50] sm:$0xff] }
  0x12   :  { %472 = vmatpush.bf16.msra.mxu2 %v757_v6  ;;  %v763_v15 = vld [vmem:[#allocation5 + $0xe0] sm:$0xff]  ;;  %v762_v19 = vld [vmem:[#allocation5 + $0xd8] sm:$0xff]  ;;  %v753_v22 = vld [vmem:[#allocation5 + $0x90] sm:$0xff] }
  0x13   :  { %485 = vmatpush.bf16.msra.mxu3 %v765_v7  ;;  %v761_v23 = vld [vmem:[#allocation5 + $0xd0] sm:$0xff]  ;;  %v736_v24 = vld [vmem:[#allocation5 + $0x8] sm:$0xff]  ;;  %v735_v28 = vld [vmem:[#allocation5] sm:$0xff] }
  0x14   :  { %447 = vmatpush.bf16.msra.mxu0 %v740_v8  ;;  %v744_v25 = vld [vmem:[#allocation5 + $0x48] sm:$0xff]  ;;  %v743_v29 = vld [vmem:[#allocation5 + $0x40] sm:$0xff]  ;;  %v45_v30 = vld [vmem:[#allocation2] sm:$0xff] }
  0x15   :  { %460 = vmatpush.bf16.msra.mxu1 %v748_v9  ;;  %v752_v26 = vld [vmem:[#allocation5 + $0x88] sm:$0xff]  ;;  %v46_v31 = vld [vmem:[#allocation2 + $0x8] sm:$0xff]  ;;  %v751_v34 = vld [vmem:[#allocation5 + $0x80] sm:$0xff]  ;;  %v51_v36 = vpack.c.bf16 %v45_v30, %v45_v30 }
  0x16   :  { %473 = vmatpush.bf16.msra.mxu2 %v756_v10  ;;  %v760_v27 = vld [vmem:[#allocation5 + $0xc8] sm:$0xff]  ;;  %v774_v32 = vld [vmem:[#allocation5 + $0x138] sm:$0xff]  ;;  %v759_v35 = vld [vmem:[#allocation5 + $0xc0] sm:$0xff]  ;;  %v52_v37 = vpack.c.bf16 %v46_v31, %v46_v31 }
  0x17   :  { %486 = vmatpush.bf16.msra.mxu3 %v764_v11  ;;  %v782_v33 = vld [vmem:[#allocation5 + $0x178] sm:$0xff]  ;;  %v47_v38 = vld [vmem:[#allocation2 + $0x10] sm:$0xff]  ;;  %v48_v39 = vld [vmem:[#allocation2 + $0x18] sm:$0xff] }
  0x18   :  { %448 = vmatpush.bf16.msra.mxu0 %v739_v12  ;;  %v773_v40 = vld [vmem:[#allocation5 + $0x130] sm:$0xff]  ;;  %v53_v42 = vpack.c.bf16 %v47_v38, %v47_v38  ;;  %v54_v43 = vpack.c.bf16 %v48_v39, %v48_v39  ;;  %v772_v44 = vld [vmem:[#allocation5 + $0x128] sm:$0xff]  ;;  %v771_v46 = vld [vmem:[#allocation5 + $0x120] sm:$0xff] }
  0x19   :  { %461 = vmatpush.bf16.msra.mxu1 %v747_v13  ;;  %v781_v41 = vld [vmem:[#allocation5 + $0x170] sm:$0xff]  ;;  %v780_v45 = vld [vmem:[#allocation5 + $0x168] sm:$0xff]  ;;  %v779_v47 = vld [vmem:[#allocation5 + $0x160] sm:$0xff] }
  0x1a   :  { %474 = vmatpush.bf16.msra.mxu2 %v755_v14  ;;  %v770_v48 = vld [vmem:[#allocation5 + $0x118] sm:$0xff]  ;;  %v769_v50 = vld [vmem:[#allocation5 + $0x110] sm:$0xff]  ;;  %v768_v52 = vld [vmem:[#allocation5 + $0x108] sm:$0xff] }
  0x1b   :  { %487 = vmatpush.bf16.msra.mxu3 %v763_v15  ;;  %v778_v49 = vld [vmem:[#allocation5 + $0x158] sm:$0xff]  ;;  %v777_v51 = vld [vmem:[#allocation5 + $0x150] sm:$0xff]  ;;  %v776_v53 = vld [vmem:[#allocation5 + $0x148] sm:$0xff] }
  0x1c   :  { %449 = vmatpush.bf16.msra.mxu0 %v738_v16  ;;  %v767_v54 = vld [vmem:[#allocation5 + $0x100] sm:$0xff]  ;;  %v49_v56 = vld [vmem:[#allocation2 + $0x20] sm:$0xff]  ;;  %v50_v57 = vld [vmem:[#allocation2 + $0x28] sm:$0xff] }
  0x1d   :  { %462 = vmatpush.bf16.msra.mxu1 %v746_v17  ;;  %v775_v55 = vld [vmem:[#allocation5 + $0x140] sm:$0xff]  ;;  %v55_v58 = vpack.c.bf16 %v49_v56, %v49_v56  ;;  %v56_v59 = vpack.c.bf16 %v50_v57, %v50_v57  ;;  %v788_v2 = vld [vmem:[%s906_s2] ss:$0 sm:$0xff] }
  0x1e   :  { %475 = vmatpush.bf16.msra.mxu2 %v754_v18 }
  0x1f   :  { %488 = vmatpush.bf16.msra.mxu3 %v762_v19 }
  0x20   :  { %450 = vmatpush.bf16.msra.mxu0 %v737_v20 }
  0x21   :  { %463 = vmatpush.bf16.msra.mxu1 %v745_v21 }
  0x22   :  { %476 = vmatpush.bf16.msra.mxu2 %v753_v22 }
  0x23   :  { %489 = vmatpush.bf16.msra.mxu3 %v761_v23 }
  0x24   :  { %451 = vmatpush.bf16.msra.mxu0 %v736_v24 }
  0x25   :  { %464 = vmatpush.bf16.msra.mxu1 %v744_v25 }
  0x26   :  { %477 = vmatpush.bf16.msra.mxu2 %v752_v26 }
  0x27   :  { %490 = vmatpush.bf16.msra.mxu3 %v760_v27 }
  0x28   :  { %452 = vmatpush.bf16.msra.mxu0 %v735_v28 }
  0x29   :  { %465 = vmatpush.bf16.msra.mxu1 %v743_v29 }
  0x2a   :  { %478 = vmatpush.bf16.msra.mxu2 %v751_v34 }
  0x2b   :  { %491 = vmatpush.bf16.msra.mxu3 %v759_v35  ;;  %453 = vmatmul.bf16.vlgmr.msra.gmra.mxu0 %v51_v36 }
  0x2c   :  { %497 = vmatpush.bf16.msrb.mxu0 %v774_v32  ;;  %466 = vmatmul.bf16.vlgmr.msra.gmra.mxu1 %v52_v37 }
  0x2d   :  { %510 = vmatpush.bf16.msrb.mxu1 %v782_v33  ;;  %479 = vmatmul.bf16.vlgmr.msra.gmra.mxu2 %v53_v42 }
  0x2e   :  { %492 = vmatmul.bf16.vlgmr.msra.gmra.mxu3 %v54_v43 }
  0x30   :  { %498 = vmatpush.bf16.msrb.mxu0 %v773_v40 }
  0x31   :  { %511 = vmatpush.bf16.msrb.mxu1 %v781_v41 }
  0x34   :  { %499 = vmatpush.bf16.msrb.mxu0 %v772_v44 }
  0x35   :  { %512 = vmatpush.bf16.msrb.mxu1 %v780_v45 }
  0x38   :  { %500 = vmatpush.bf16.msrb.mxu0 %v771_v46 }
  0x39   :  { %513 = vmatpush.bf16.msrb.mxu1 %v779_v47 }
  0x3c   :  { %501 = vmatpush.bf16.msrb.mxu0 %v770_v48 }
  0x3d   :  { %514 = vmatpush.bf16.msrb.mxu1 %v778_v49 }
  0x40   :  { %502 = vmatpush.bf16.msrb.mxu0 %v769_v50 }
  0x41   :  { %515 = vmatpush.bf16.msrb.mxu1 %v777_v51 }
  0x44   :  { %503 = vmatpush.bf16.msrb.mxu0 %v768_v52 }
  0x45   :  { %516 = vmatpush.bf16.msrb.mxu1 %v776_v53 }
  0x48   :  { %504 = vmatpush.bf16.msrb.mxu0 %v767_v54 }
  0x49   :  { %517 = vmatpush.bf16.msrb.mxu1 %v775_v55 }
  0x4b   :  { %505 = vmatmul.bf16.vlgmr.msrb.gmra.mxu0 %v55_v58 }
  0x4c   :  { %518 = vmatmul.bf16.vlgmr.msrb.gmra.mxu1 %v56_v59 }
  0xa8   :  { %v454_v60 = vpop.f32.mrf.mxu0 }
  0xa9   :  { %v467_v61 = vpop.f32.mrf.mxu1  ;;  %v455_v3 = vadd.f32 %v788_v2, %v454_v60 }
  0xab   :  { %v468_v6 = vadd.f32 %v467_v61, %v455_v3 }
  0xb0   :  { %v456_v62 = vpop.f32.mrf.mxu0  ;;  %v480_v0 = vpop.f32.mrf.mxu2 }
  0xb1   :  { %v469_v63 = vpop.f32.mrf.mxu1  ;;  %v493_v1 = vpop.f32.mrf.mxu3  ;;  %v481_v7 = vadd.f32 %v480_v0, %v468_v6 }
  0xb3   :  { %v494_v8 = vadd.f32 %v493_v1, %v481_v7 }
  0xb8   :  { %v482_v4 = vpop.f32.mrf.mxu2 }
  0xb9   :  { %v495_v5 = vpop.f32.mrf.mxu3 }
  0xc8   :  { %v506_v9 = vpop.f32.mrf.mxu0 }
  0xc9   :  { %v519_v10 = vpop.f32.mrf.mxu1  ;;  %v507_v11 = vadd.f32 %v506_v9, %v494_v8 }
  0xcb   :  { %v520_v12 = vadd.f32 %v519_v10, %v507_v11 }
  0xcd   :  { %v523_v13 = vpack.c.bf16 %v520_v12, %v520_v12 }
  0xcf   :  { %524 = vst [vmem:[#allocation7] sm:$0xf] %v523_v13 }
  0xd0   :  { %v508_v14 = vpop.f32.mrf.mxu0  ;;  %535 = dma.vmem_to_hbm [thread:$0]  %s531_s25, 64, %s533_s28, [#allocation4]  }
  0xd1   :  { %v521_v15 = vpop.f32.mrf.mxu1 }
  0xd2   :  { %865 = dma.done.wait [#allocation4], 64  }
  0xd3   :  { %866 = vsyncadd [#allocation4], 4294967232 }
  0xd4   :  { %540 = vsyncpa [#allocation3], 1 }
  0xd5   :  { %541 = vsyncpa [#allocation6], 1 }
  0xd6   :  { %542 = vsyncpa [#allocation4], 1 }

</bundles_post_ra>
